<compile_context>
chip_gen: v7x
topology: tpu7x:2x2x1
jax: 0.10.0
libtpu: 0.0.40
codegen_flags: <defaults>
</compile_context>

<pallas_src>
import jax
import jax.numpy as jnp
from jax.experimental import pallas as pl
from jax.experimental.pallas import tpu as pltpu


def _round_up(x: int, m: int) -> int:
    return (x + m - 1) // m * m


def _make_mlp_kernel(batch: int, batch_pad: int, eps: float, th: int, n_h_per_core: int):
    """Kernel for grid=(num_core_splits, n_h_per_core)."""
    inv_b = 1.0 / float(batch)

    def kernel(x_ref, w1_ref, gamma_ref, beta_ref, w2_ref, o_ref):
        c = pl.program_id(0)   # TensorCore split of the hidden axis ("parallel")
        k = pl.program_id(1)   # hidden-tile index within this core's half

        # ---- Linear 1 for this hidden tile (MXU, f32 accumulation). -----------
        # The Linear-1 bias is intentionally omitted: train-mode BatchNorm
        # subtracts the per-feature batch mean, which cancels any constant bias.
        h = jnp.dot(x_ref[...], w1_ref[...], preferred_element_type=jnp.float32)

        # ---- BatchNorm1d (training mode): biased batch stats, f32. -------------
        # Each hidden tile sees *all* batch rows for its features, so tiling the
        # hidden dim keeps the statistics exact.  Padded batch rows are masked.
        if batch_pad == batch:
            mean = jnp.mean(h, axis=0, keepdims=True)
            centered = h - mean
            var = jnp.mean(centered * centered, axis=0, keepdims=True)
        else:
            rows = jax.lax.broadcasted_iota(jnp.int32, (batch_pad, 1), 0)
            mask = (rows < batch).astype(jnp.float32)
            mean = jnp.sum(h * mask, axis=0, keepdims=True) * inv_b
            centered = (h - mean) * mask
            var = jnp.sum(centered * centered, axis=0, keepdims=True) * inv_b

        # gamma/beta are grid-invariant full rows: slice this tile in-register
        # (128-aligned dynamic start -> no per-step DMA descriptors).
        start = pl.multiple_of((c * n_h_per_core + k) * th, 128)
        gamma_row = gamma_ref[:, pl.ds(start, th)]
        beta_row = beta_ref[:, pl.ds(start, th)]

        # Fused normalize + affine:  y = h*s + t, then ReLU (all f32).
        s = gamma_row * jax.lax.rsqrt(var + eps)
        t = beta_row - mean * s
        h = jnp.maximum(h * s + t, 0.0)

        # ---- Linear 2 (bias=False): partial product for this hidden tile. ------
        partial = jnp.dot(h.astype(w2_ref.dtype), w2_ref[...],
                          preferred_element_type=jnp.float32)

        if n_h_per_core == 1:
            # Single reduction step for this core: store directly, no accumulator.
            o_ref[...] = partial.astype(o_ref.dtype)
        else:
            # Output block (f32) is resident across the "arbitrary" hidden axis:
            # use it as the accumulator directly (no scratch, no extra VMEM copy).
            @pl.when(k == 0)
            def _init():
                o_ref[...] = jnp.zeros_like(o_ref)

            o_ref[...] += partial

    return kernel


def mlp_forward(x, w1, b1, gamma, beta, w2, *, eps=1e-5,
                compute_dtype=jnp.bfloat16, h_tile=None, core_split=None):
    """Fused Linear -> BatchNorm1d(train) -> ReLU -> Linear(no bias).

    x            : [B, ...]  (flattened to [B, in_dim], like torch.flatten(1))
    w1           : [in_dim, h_dim]   (transposed vs PyTorch)
    b1           : [h_dim]-like; accepted for API parity only — it cancels exactly
                   under train-mode BatchNorm and is not fed to the kernel.
    gamma, beta  : [h_dim]-like (BatchNorm affine)
    w2           : [h_dim, out_dim]  (transposed vs PyTorch)
    compute_dtype: MXU operand dtype (bf16 for performance, f32 for exactness).
    h_tile       : optional forced hidden-tile size (testing / tuning).
    core_split   : optional forced size of the leading "parallel" grid axis.
    """
    del b1  # exactly cancelled by the mean subtraction of train-mode BatchNorm

    B = x.shape[0]
    x2d = x.reshape(B, -1)  # == torch.flatten(1)
    in_dim = x2d.shape[1]
    h_dim = w1.shape[1]
    out_dim = w2.shape[1]
    out_dtype = x2d.dtype

    itemsize = jnp.dtype(compute_dtype).itemsize
    # bf16 packs two rows per sublane (native (16,128) tile): pad the batch to 16.
    B_pad = _round_up(B, 16 if itemsize == 2 else 8)
    in_pad = _round_up(in_dim, 128)
    out_pad = _round_up(out_dim, 128)       # lane-dense output stores
    h_pad0 = _round_up(h_dim, 128)

    # ---- Generation-aware VMEM budget (v7x: 64 MiB/TC, v5e/v6e: 128 MiB). ------
    try:
        vmem_cap = int(pltpu.get_tpu_info().vmem_capacity_bytes)
    except Exception:
        vmem_cap = 64 << 20  # conservative fallback = v7x per-core VMEM
    budget = min(vmem_cap * 5 // 8, 96 << 20)  # ~40 MiB on v7x, ~80 MiB on v5e/v6e

    def _footprint(th, h_pad_total, n_steps):
        bufs = 2 if n_steps > 1 else 1               # double-buffer only when tiled
        f = 2 * B_pad * in_pad * itemsize            # x (grid-invariant; budget 2 bufs)
        f += bufs * in_pad * th * itemsize           # W1 hidden slab(s)
        f += bufs * th * out_pad * itemsize          # W2 hidden slab(s)
        f += 2 * 2 * 8 * h_pad_total * 4             # gamma/beta rows: (8, h_pad) physical
        f += 2 * B_pad * out_pad * 4                 # output block (f32 worst case)
        return f

    def _plan(th):
        n_total = -(-h_pad0 // th)
        return n_total, _footprint(th, n_total * th, n_total)

    # ---- Hidden-tile size: collapse the grid when everything fits the budget,
    # otherwise take the largest TH that fits. ------------------------------------
    if h_tile is not None:
        TH = max(128, _round_up(min(int(h_tile), h_pad0), 128))
    else:
        TH = 128
        for cand in (h_pad0, 2048, 1024, 512, 256, 128):
            if cand > h_pad0:
                continue
            if _plan(cand)[1] <= budget:
                TH = cand
                break
        # TODO(synk): when even TH=128 exceeds the budget (very large in_dim), add
        # an inner reduction grid axis over in_pad instead of only raising the limit.

    n_total = _plan(TH)[0]
    # Megacore: split hidden tiles across the two v7x TensorCores ("parallel"
    # leading axis); on single-TC v5e/v6e it is just a short sequential loop.
    if core_split is not None:
        NC = max(1, int(core_split))
    else:
        NC = 2 if n_total >= 2 else 1
    n_total = _round_up(n_total, NC)
    n_h_per_core = n_total // NC
    h_pad = n_total * TH
    n_steps = NC * n_h_per_core

    def pad2(a, rows, cols, dtype):
        a = jnp.asarray(a, dtype)
        return jnp.pad(a, ((0, rows - a.shape[0]), (0, cols - a.shape[1])))

    x_p = pad2(x2d, B_pad, in_pad, compute_dtype)
    w1_p = pad2(w1, in_pad, h_pad, compute_dtype)
    w2_p = pad2(w2, h_pad, out_pad, compute_dtype)
    gamma_p = pad2(jnp.asarray(gamma).reshape(1, -1), 1, h_pad, jnp.float32)
    beta_p = pad2(jnp.asarray(beta).reshape(1, -1), 1, h_pad, jnp.float32)

    # Whenever more than one contribution hits an output block (tiled hidden axis
    # and/or core split), keep the kernel output in f32 and cast once in the
    # wrapper; single-step single-core outputs store in out_dtype directly.
    o_dtype = out_dtype if (NC == 1 and n_h_per_core == 1) else jnp.float32

    # vmem_limit tied to the actual footprint (never a blanket 64 MiB, never below
    # the footprint the chosen tiling needs).
    fp = _footprint(TH, h_pad, n_steps)
    vmem_limit = int(min(max(fp + (4 << 20), 16 << 20), vmem_cap * 9 // 10))

    cost = pl.CostEstimate(
        flops=2 * B_pad * in_pad * h_pad + 2 * B_pad * h_pad * out_pad,
        transcendentals=h_pad,  # one rsqrt per hidden feature
        bytes_accessed=(x_p.size + w1_p.size + w2_p.size) * itemsize
        + (gamma_p.size + beta_p.size) * 4
        + NC * B_pad * out_pad * jnp.dtype(o_dtype).itemsize,
    )

    kernel = _make_mlp_kernel(B, B_pad, eps, TH, n_h_per_core)
    nh = n_h_per_core  # closure constant for the index maps

    # TODO(synk): optional roofline levers — fp8 (v7x) / int8 (v5e/v6e) W1 path
    # with per-column scales folded into the BN scale, and pl.Buffered(3) on the
    # W1 spec when n_h_per_core >= 4 (sweep on hardware).
    out_p = pl.pallas_call(
        kernel,
        out_shape=jax.ShapeDtypeStruct((NC * B_pad, out_pad), o_dtype),
        grid_spec=pltpu.PrefetchScalarGridSpec(
            num_scalar_prefetch=0,
            grid=(NC, n_h_per_core),
            in_specs=[
                pl.BlockSpec((B_pad, in_pad), lambda c, k: (0, 0)),        # x (invariant)
                pl.BlockSpec((in_pad, TH), lambda c, k: (0, c * nh + k)),  # W1 tile
                pl.BlockSpec((1, h_pad), lambda c, k: (0, 0)),             # gamma (invariant)
                pl.BlockSpec((1, h_pad), lambda c, k: (0, 0)),             # beta (invariant)
                pl.BlockSpec((TH, out_pad), lambda c, k: (c * nh + k, 0)),  # W2 tile
            ],
            out_specs=pl.BlockSpec((B_pad, out_pad), lambda c, k: (c, 0)),
        ),
        compiler_params=pltpu.CompilerParams(
            dimension_semantics=("parallel", "arbitrary"),
            vmem_limit_bytes=vmem_limit,
        ),
        cost_estimate=cost,
    )(x_p, w1_p, gamma_p, beta_p, w2_p)

    if NC > 1:
        out_p = out_p.reshape(NC, B_pad, out_pad).sum(axis=0)
    return out_p[:B, :out_dim].astype(out_dtype)


# ------------------------------ references ------------------------------------
def _reference_f32(x2d, w1, b1, gamma, beta, w2, eps=1e-5):
    h = x2d @ w1 + b1
    mu = h.mean(0, keepdims=True)
    var = ((h - mu) ** 2).mean(0, keepdims=True)
    h = (h - mu) / jnp.sqrt(var + eps) * gamma + beta
    h = jnp.maximum(h, 0.0)
    return h @ w2


def _reference_bf16_mxu(x2d, w1, b1, gamma, beta, w2, eps=1e-5):
    h = jnp.dot(x2d.astype(jnp.bfloat16), w1.astype(jnp.bfloat16),
                preferred_element_type=jnp.float32) + b1
    mu = h.mean(0, keepdims=True)
    var = ((h - mu) ** 2).mean(0, keepdims=True)
    h = (h - mu) / jnp.sqrt(var + eps) * gamma + beta
    h = jnp.maximum(h, 0.0)
    return jnp.dot(h.astype(jnp.bfloat16), w2.astype(jnp.bfloat16),
                   preferred_element_type=jnp.float32)


if __name__ == "__main__":
    key = jax.random.PRNGKey(0)

    # ---- Config 1: small shapes consistent with the module (NCHW -> flatten). --
    B, C, H, W = 2, 4, 16, 16
    in_dim, h_dim, out_dim = C * H * W, 32, 16   # module default h_dim=1024; small demo
    k1, k2, k3, k4, k5, k6, key = jax.random.split(key, 7)
    x = jax.random.normal(k1, (B, C, H, W), dtype=jnp.float32)
    # Parameters stored transposed vs PyTorch ([in, h] / [h, out]).
    w1 = jax.random.normal(k2, (in_dim, h_dim), dtype=jnp.float32) * 0.02
    b1 = jax.random.normal(k3, (1, h_dim), dtype=jnp.float32) * 0.01
    gamma = 1.0 + 0.1 * jax.random.normal(k4, (1, h_dim), dtype=jnp.float32)
    beta = 0.1 * jax.random.normal(k5, (1, h_dim), dtype=jnp.float32)
    w2 = jax.random.normal(k6, (h_dim, out_dim), dtype=jnp.float32) * 0.02

    x2d = x.reshape(B, -1)
    ref_f32 = _reference_f32(x2d, w1, b1, gamma, beta, w2)
    ref_mixed = _reference_bf16_mxu(x2d, w1, b1, gamma, beta, w2)

    # 1) f32 compute path, auto-planned (grid collapses to a single step).
    out = jax.block_until_ready(
        mlp_forward(x, w1, b1, gamma, beta, w2, compute_dtype=jnp.float32))
    assert out.shape == (B, out_dim)
    assert jnp.allclose(out, ref_f32, atol=1e-4, rtol=1e-4), "f32 (collapsed) mismatch"

    # 2) bf16 MXU path, auto-planned: match a reference with the same bf16 casts.
    out = jax.block_until_ready(mlp_forward(x, w1, b1, gamma, beta, w2))
    assert out.shape == (B, out_dim)
    assert jnp.allclose(out, ref_mixed, atol=1e-3, rtol=1e-3), "bf16 (collapsed) mismatch"

    # 3) f32 path with a forced 2-way core split (exercises the megacore axis,
    #    the dynamic gamma/beta slicing and the partial-sum epilogue).
    out = jax.block_until_ready(
        mlp_forward(x, w1, b1, gamma, beta, w2, compute_dtype=jnp.float32,
                    h_tile=128, core_split=2))
    assert out.shape == (B, out_dim)
    assert jnp.allclose(out, ref_f32, atol=1e-4, rtol=1e-4), "f32 (2-core split) mismatch"

    # ---- Config 2: >1 hidden tile per core (exercises resident-output f32 accum).
    B2, in2, h2, out2 = 4, 256, 384, 16
    k1, k2, k3, k4, k5, k6, key = jax.random.split(key, 7)
    x_b = jax.random.normal(k1, (B2, in2), dtype=jnp.float32)
    w1_b = jax.random.normal(k2, (in2, h2), dtype=jnp.float32) * 0.02
    b1_b = jax.random.normal(k3, (1, h2), dtype=jnp.float32) * 0.01
    gamma_b = 1.0 + 0.1 * jax.random.normal(k4, (1, h2), dtype=jnp.float32)
    beta_b = 0.1 * jax.random.normal(k5, (1, h2), dtype=jnp.float32)
    w2_b = jax.random.normal(k6, (h2, out2), dtype=jnp.float32) * 0.02
    ref_b = _reference_f32(x_b, w1_b, b1_b, gamma_b, beta_b, w2_b)

    out = jax.block_until_ready(
        mlp_forward(x_b, w1_b, b1_b, gamma_b, beta_b, w2_b,
                    compute_dtype=jnp.float32, h_tile=128, core_split=2))
    assert out.shape == (B2, out2)
    assert jnp.allclose(out, ref_b, atol=1e-4, rtol=1e-4), "f32 (tiled accumulate) mismatch"

    print("KERNEL_OK")
</pallas_src>

<mosaic_0001>
module attributes {stable_mosaic.version = 11 : i64} {
  func.func @kernel(%arg0: i32, %arg1: i32, %arg2: memref<8x1024xf32, #tpu.memory_space<vmem>>, %arg3: memref<1024x128xf32, #tpu.memory_space<vmem>>, %arg4: memref<1x128xf32, #tpu.memory_space<vmem>>, %arg5: memref<1x128xf32, #tpu.memory_space<vmem>>, %arg6: memref<128x128xf32, #tpu.memory_space<vmem>>, %arg7: memref<8x128xf32, #tpu.memory_space<vmem>>) attributes {dimension_semantics = [#tpu.dimension_semantics<parallel>, #tpu.dimension_semantics<arbitrary>], iteration_bounds = array<i64: 1, 1>, scalar_prefetch = 0 : i64, scratch_operands = 0 : i64, tpu.core_type = #tpu.core_type<tc>, window_params = [{pipeline_mode = #tpu.pipeline_mode<synchronous>, transform_indices = @transform_0, window_bounds = array<i64: 8, 1024>}, {transform_indices = @transform_1, window_bounds = array<i64: 1024, 128>}, {pipeline_mode = #tpu.pipeline_mode<synchronous>, transform_indices = @transform_2, window_bounds = array<i64: 1, 128>}, {pipeline_mode = #tpu.pipeline_mode<synchronous>, transform_indices = @transform_3, window_bounds = array<i64: 1, 128>}, {transform_indices = @transform_4, window_bounds = array<i64: 128, 128>}, {transform_indices = @transform_5, window_bounds = array<i64: 8, 128>}]} {
    %c0 = arith.constant 0 : index
    %c0_0 = arith.constant 0 : index
    %0 = vector.load %arg2[%c0, %c0_0] : memref<8x1024xf32, #tpu.memory_space<vmem>>, vector<8x1024xf32>
    %c0_1 = arith.constant 0 : index
    %c0_2 = arith.constant 0 : index
    %1 = vector.load %arg3[%c0_1, %c0_2] : memref<1024x128xf32, #tpu.memory_space<vmem>>, vector<1024x128xf32>
    %cst = arith.constant dense<0.000000e+00> : vector<8x128xf32>
    %2 = tpu.matmul %0, %1, %cst {dimension_numbers = #tpu.dot_dimension_numbers<[1], [0], [0], [1], [0, 0, 1, 1], [], []>} : vector<8x1024xf32>, vector<1024x128xf32>, vector<8x128xf32> -> vector<8x128xf32>
    %3 = tpu.iota {dimensions = array<i32: 0>} : vector<8x1xi32>
    %c2_i32 = arith.constant 2 : i32
    %4 = vector.broadcast %c2_i32 : i32 to vector<8x1xi32>
    %5 = arith.cmpi slt, %3, %4 : vector<8x1xi32>
    %6 = arith.extui %5 : vector<8x1xi1> to vector<8x1xi32>
    %7 = arith.sitofp %6 : vector<8x1xi32> to vector<8x1xf32>
    %8 = vector.broadcast %7 : vector<8x1xf32> to vector<8x128xf32>
    %9 = arith.mulf %2, %8 : vector<8x128xf32>
    %cst_3 = arith.constant dense<0.000000e+00> : vector<128xf32>
    %10 = vector.multi_reduction <add>, %9, %cst_3 [0] : vector<8x128xf32> to vector<128xf32>
    %11 = vector.shape_cast %10 : vector<128xf32> to vector<1x128xf32>
    %cst_4 = arith.constant 5.000000e-01 : f32
    %12 = vector.broadcast %cst_4 : f32 to vector<1x128xf32>
    %13 = arith.mulf %11, %12 : vector<1x128xf32>
    %14 = vector.broadcast %13 : vector<1x128xf32> to vector<8x128xf32>
    %15 = arith.subf %2, %14 : vector<8x128xf32>
    %16 = vector.broadcast %7 : vector<8x1xf32> to vector<8x128xf32>
    %17 = arith.mulf %15, %16 : vector<8x128xf32>
    %18 = arith.mulf %17, %17 : vector<8x128xf32>
    %cst_5 = arith.constant dense<0.000000e+00> : vector<128xf32>
    %19 = vector.multi_reduction <add>, %18, %cst_5 [0] : vector<8x128xf32> to vector<128xf32>
    %20 = vector.shape_cast %19 : vector<128xf32> to vector<1x128xf32>
    %cst_6 = arith.constant 5.000000e-01 : f32
    %21 = vector.broadcast %cst_6 : f32 to vector<1x128xf32>
    %22 = arith.mulf %20, %21 : vector<1x128xf32>
    %c1_i32 = arith.constant 1 : i32
    %23 = arith.muli %arg0, %c1_i32 : i32
    %24 = arith.addi %23, %arg1 : i32
    %c128_i32 = arith.constant 128 : i32
    %25 = arith.muli %24, %c128_i32 : i32
    %26 = tpu.assume_multiple %25, 128 : i32
    %c0_7 = arith.constant 0 : index
    %27 = arith.index_cast %26 : i32 to index
    %28 = vector.load %arg4[%c0_7, %27] : memref<1x128xf32, #tpu.memory_space<vmem>>, vector<1x128xf32>
    %c0_8 = arith.constant 0 : index
    %29 = arith.index_cast %26 : i32 to index
    %30 = vector.load %arg5[%c0_8, %29] : memref<1x128xf32, #tpu.memory_space<vmem>>, vector<1x128xf32>
    %cst_9 = arith.constant 9.99999974E-6 : f32
    %31 = vector.broadcast %cst_9 : f32 to vector<1x128xf32>
    %32 = arith.addf %22, %31 : vector<1x128xf32>
    %33 = math.rsqrt %32 : vector<1x128xf32>
    %34 = arith.mulf %28, %33 : vector<1x128xf32>
    %35 = arith.mulf %13, %34 : vector<1x128xf32>
    %36 = arith.subf %30, %35 : vector<1x128xf32>
    %37 = vector.broadcast %34 : vector<1x128xf32> to vector<8x128xf32>
    %38 = arith.mulf %2, %37 : vector<8x128xf32>
    %39 = vector.broadcast %36 : vector<1x128xf32> to vector<8x128xf32>
    %40 = arith.addf %38, %39 : vector<8x128xf32>
    %cst_10 = arith.constant 0.000000e+00 : f32
    %41 = vector.broadcast %cst_10 : f32 to vector<8x128xf32>
    %42 = arith.maximumf %40, %41 : vector<8x128xf32>
    %c0_11 = arith.constant 0 : index
    %c0_12 = arith.constant 0 : index
    %43 = vector.load %arg6[%c0_11, %c0_12] : memref<128x128xf32, #tpu.memory_space<vmem>>, vector<128x128xf32>
    %cst_13 = arith.constant dense<0.000000e+00> : vector<8x128xf32>
    %44 = tpu.matmul %42, %43, %cst_13 {dimension_numbers = #tpu.dot_dimension_numbers<[1], [0], [0], [1], [0, 0, 1, 1], [], []>} : vector<8x128xf32>, vector<128x128xf32>, vector<8x128xf32> -> vector<8x128xf32>
    %c0_14 = arith.constant 0 : index
    %c0_15 = arith.constant 0 : index
    %45 = vector.load %arg7[%c0_14, %c0_15] : memref<8x128xf32, #tpu.memory_space<vmem>>, vector<8x128xf32>
    tpu.vector_store %arg7[%c0_14, %c0_15], %44 {strides = array<i32>} : memref<8x128xf32, #tpu.memory_space<vmem>>, vector<8x128xf32>,
    return
  }
  func.func @transform_0(%arg0: i32, %arg1: i32) -> (i32, i32) {
    %c0_i32 = arith.constant 0 : i32
    %c0_i32_0 = arith.constant 0 : i32
    %c0_i32_1 = arith.constant 0 : i32
    return %c0_i32, %c0_i32_0 : i32, i32
  }
  func.func @transform_1(%arg0: i32, %arg1: i32) -> (i32, i32) {
    %c1_i32 = arith.constant 1 : i32
    %0 = arith.muli %arg0, %c1_i32 : i32
    %1 = arith.addi %0, %arg1 : i32
    %c0_i32 = arith.constant 0 : i32
    %c0_i32_0 = arith.constant 0 : i32
    return %c0_i32, %1 : i32, i32
  }
  func.func @transform_2(%arg0: i32, %arg1: i32) -> (i32, i32) {
    %c0_i32 = arith.constant 0 : i32
    %c0_i32_0 = arith.constant 0 : i32
    %c0_i32_1 = arith.constant 0 : i32
    return %c0_i32, %c0_i32_0 : i32, i32
  }
  func.func @transform_3(%arg0: i32, %arg1: i32) -> (i32, i32) {
    %c0_i32 = arith.constant 0 : i32
    %c0_i32_0 = arith.constant 0 : i32
    %c0_i32_1 = arith.constant 0 : i32
    return %c0_i32, %c0_i32_0 : i32, i32
  }
  func.func @transform_4(%arg0: i32, %arg1: i32) -> (i32, i32) {
    %c1_i32 = arith.constant 1 : i32
    %0 = arith.muli %arg0, %c1_i32 : i32
    %1 = arith.addi %0, %arg1 : i32
    %c0_i32 = arith.constant 0 : i32
    %c0_i32_0 = arith.constant 0 : i32
    return %1, %c0_i32 : i32, i32
  }
  func.func @transform_5(%arg0: i32, %arg1: i32) -> (i32, i32) {
    %c0_i32 = arith.constant 0 : i32
    %c0_i32_0 = arith.constant 0 : i32
    return %arg0, %c0_i32 : i32, i32
  }
}

</mosaic_0001>

<bundles_post_ra>
// kernel: tpu_custom_call.1
= control target key start
LH: loop header
LB: loop body
LE: loop exit
PB: predicated region body
PF: predicated region fallthrough
CT: control target
= control target key end

     0   :  { %10 = vsyncpa [#allocation3], 0  ;;  %s1191_s0 = inlined_call_operand.hbm [shape: f32[8,1024], index: 0, kind: input, shape index: {}]   ;;  %s1192_s1 = inlined_call_operand.hbm [shape: f32[1024,128], index: 1, kind: input, shape index: {}]   ;;  %s1193_s2 = inlined_call_operand.vmem [shape: f32[1,128], index: 2, kind: input, shape index: {}]   ;;  %s1194_s3 = inlined_call_operand.vmem [shape: f32[1,128], index: 3, kind: input, shape index: {}]   ;;  %s1195_s4 = inlined_call_operand.hbm [shape: f32[128,128], index: 4, kind: input, shape index: {}]   ;;  %s1196_s5 = inlined_call_operand.hbm [shape: f32[8,128], index: 5, kind: output, shape index: {}]  }
   0x1   :  { %11 = vsyncpa [#allocation6], 0 }
   0x2   :  { %12 = vsyncpa [#allocation4], 0  ;;  %s1092_s18 = smov [#allocation5]   ;;  %s998_s22 = scalar_lea.hbm %s1192_s1, 16384 }
   0x3   :  { %s31_s19 = sshll.u32 %s1092_s18, 4  ;;  %p999_p0 = scmp.ne.s32.totalorder %s1192_s1, %s998_s22  ;;  %s32_s19 = int_to_ptr.vmem [resolvable:$true] %s31_s19 }
   0x4   :  { %p1002_p1 = scmp.lt.u32.totalorder %s998_s22, %s1192_s1 }
   0x6   :  { %p1004_p2 = pnand %p1002_p1, %p999_p0 }
   0x8   :  { %1007 = shalt.err (!%p1004_p2)
}
   0x9   :  { %s1008_s27 = scalar_lea.vmem %s32_s19, 16384  ;;  %p1013_p4 = scmp.lt.s32.totalorder %s32_s19, %s32_s19 }
   0xa   :  { %p1009_p3 = scmp.ne.s32.totalorder %s32_s19, %s1008_s27  ;;  %p1014_p5 = scmp.lt.s32.totalorder %s1008_s27, %s1008_s27 }
   0xc   :  { %p1015_p6 = por %p1014_p5, %p1013_p4 }
   0xe   :  { %p1016_p7 = pnand %p1015_p6, %p1009_p3 }
  0x10   :  { %1019 = shalt.err (!%p1016_p7)
}
  0x11   :  { %s1093_s28 = smov 128   ;;  %s1094_s29 = smov 8  }
  0x12   :  { %37 = dma.hbm_to_vmem [thread:$0]  %s1192_s1, 16384, %s32_s19, [#allocation6], %s1093_s28, %s1093_s28, %s1094_s29  }
  0x13   :  { %s1095_s7 = smov [#allocation2]   ;;  %s1096_s9 = smov [#allocation7]  }
  0x14   :  { %s19_s8 = sshll.u32 %s1095_s7, 4  ;;  %s51_s10 = sshll.u32 %s1096_s9, 4  ;;  %s20_s8 = int_to_ptr.vmem [resolvable:$true] %s19_s8  ;;  %s52_s10 = int_to_ptr.vmem [resolvable:$true] %s51_s10 }
  0x15   :  { %s1020_s13 = scalar_lea.hbm %s1191_s0, 1024 }
  0x16   :  { %p1021_p8 = scmp.ne.s32.totalorder %s1191_s0, %s1020_s13  ;;  %p1024_p9 = scmp.lt.u32.totalorder %s1020_s13, %s1191_s0 }
  0x18   :  { %p1026_p10 = pnand %p1024_p9, %p1021_p8 }
  0x1a   :  { %1029 = shalt.err (!%p1026_p10)
}
  0x1b   :  { %s1030_s1 = scalar_lea.vmem %s20_s8, 1024  ;;  %p1035_p12 = scmp.lt.s32.totalorder %s20_s8, %s20_s8 }
  0x1c   :  { %p1031_p11 = scmp.ne.s32.totalorder %s20_s8, %s1030_s1  ;;  %p1036_p13 = scmp.lt.s32.totalorder %s1030_s1, %s1030_s1 }
  0x1e   :  { %p1037_p0 = por %p1036_p13, %p1035_p12 }
  0x20   :  { %p1038_p1 = pnand %p1037_p0, %p1031_p11 }
  0x22   :  { %1041 = shalt.err (!%p1038_p1)
}
  0x23   :  { %22 = dma.hbm_to_vmem [thread:$0]  %s1191_s0, 1024, %s20_s8, [#allocation3]  }
  0x24   :  { %s1042_s22 = scalar_lea.hbm %s1195_s4, 2048 }
  0x25   :  { %p1043_p2 = scmp.ne.s32.totalorder %s1195_s4, %s1042_s22  ;;  %p1046_p3 = scmp.lt.u32.totalorder %s1042_s22, %s1195_s4 }
  0x27   :  { %p1048_p4 = pnand %p1046_p3, %p1043_p2 }
  0x29   :  { %1051 = shalt.err (!%p1048_p4)
}
  0x2a   :  { %s1052_s27 = scalar_lea.vmem %s52_s10, 2048  ;;  %p1057_p6 = scmp.lt.s32.totalorder %s52_s10, %s52_s10 }
  0x2b   :  { %p1053_p5 = scmp.ne.s32.totalorder %s52_s10, %s1052_s27  ;;  %p1058_p7 = scmp.lt.s32.totalorder %s1052_s27, %s1052_s27 }
  0x2d   :  { %p1059_p8 = por %p1058_p7, %p1057_p6 }
  0x2f   :  { %p1060_p9 = pnand %p1059_p8, %p1053_p5 }
  0x31   :  { %1063 = shalt.err (!%p1060_p9)
}
  0x32   :  { %57 = dma.hbm_to_vmem [thread:$0]  %s1195_s4, 2048, %s52_s10, [#allocation6], %s1093_s28, %s1093_s28, %s1094_s29  }
  0x33   :  { %1086 = dma.done.wait [#allocation3], 1024  }
  0x34   :  { %1087 = vsyncadd [#allocation3], 4294966272 }
  0x35   :  { %1088 = dma.done.wait [#allocation6], 18432  }
  0x36   :  { %1089 = vsyncadd [#allocation6], 4294948864  ;;  %v94_v0 = vld [vmem:[#allocation5 + $0x80] sm:$0xff]  ;;  %v95_v1 = vld [vmem:[#allocation5 + $0x88] sm:$0xff]  ;;  %vm1098_vm0 = vmmov 0   ;;  %s1100_s7 = smov [#allocation8]  }
  0x37   :  { %v126_v2 = vld [vmem:[#allocation5 + $0x180] sm:$0xff]  ;;  %v835_v3 = vpack.c.bf16 %v95_v1, %v94_v0  ;;  %v127_v4 = vld [vmem:[#allocation5 + $0x188] sm:$0xff]  ;;  %v96_v11 = vld [vmem:[#allocation5 + $0x90] sm:$0xff]  ;;  %s630_s8 = sshll.u32 %s1100_s7, 4  ;;  %s631_s8 = int_to_ptr.vmem [resolvable:$true] %s630_s8 }
  0x38   :  { %v78_v5 = vld [vmem:[#allocation5] sm:$0xff]  ;;  %v79_v6 = vld [vmem:[#allocation5 + $0x8] sm:$0xff]  ;;  %v867_v7 = vpack.c.bf16 %v127_v4, %v126_v2  ;;  %v97_v13 = vld [vmem:[#allocation5 + $0x98] sm:$0xff]  ;;  %p1069_p11 = scmp.lt.s32.totalorder %s631_s8, %s631_s8 }
  0x39   :  { %v837_v8 = vpack.c.bf16 %v79_v6, %v78_v5  ;;  %v110_v9 = vld [vmem:[#allocation5 + $0x100] sm:$0xff]  ;;  %v111_v10 = vld [vmem:[#allocation5 + $0x108] sm:$0xff]  ;;  %836 = vmatprep.subr.bf16.mxu0 %v835_v3  ;;  %v128_v14 = vld [vmem:[#allocation5 + $0x190] sm:$0xff]  ;;  %v839_v16 = vpack.c.bf16 %v97_v13, %v96_v11 }
  0x3a   :  { %v869_v12 = vpack.c.bf16 %v111_v10, %v110_v9  ;;  %v129_v15 = vld [vmem:[#allocation5 + $0x198] sm:$0xff]  ;;  %868 = vmatprep.subr.bf16.mxu1 %v867_v7  ;;  %v80_v18 = vld [vmem:[#allocation5 + $0x10] sm:$0xff]  ;;  %v98_v23 = vld [vmem:[#allocation5 + $0xa0] sm:$0xff] }
  0x3b   :  { %838 = vmatpush3.bf16.msra.mxu0 %v837_v8  ;;  %v871_v17 = vpack.c.bf16 %v129_v15, %v128_v14  ;;  %v81_v19 = vld [vmem:[#allocation5 + $0x18] sm:$0xff]  ;;  %v112_v20 = vld [vmem:[#allocation5 + $0x110] sm:$0xff]  ;;  %v99_v24 = vld [vmem:[#allocation5 + $0xa8] sm:$0xff] }
  0x3c   :  { %870 = vmatpush3.bf16.msra.mxu1 %v869_v12  ;;  %v841_v21 = vpack.c.bf16 %v81_v19, %v80_v18  ;;  %v113_v22 = vld [vmem:[#allocation5 + $0x118] sm:$0xff]  ;;  %840 = vmatprep.subr.bf16.mxu0 %v839_v16  ;;  %v843_v26 = vpack.c.bf16 %v99_v24, %v98_v23  ;;  %v130_v27 = vld [vmem:[#allocation5 + $0x1a0] sm:$0xff]  ;;  %v131_v28 = vld [vmem:[#allocation5 + $0x1a8] sm:$0xff] }
  0x3d   :  { %872 = vmatprep.subr.bf16.mxu1 %v871_v17  ;;  %v873_v25 = vpack.c.bf16 %v113_v22, %v112_v20  ;;  %v82_v29 = vld [vmem:[#allocation5 + $0x20] sm:$0xff]  ;;  %v875_v30 = vpack.c.bf16 %v131_v28, %v130_v27  ;;  %v83_v31 = vld [vmem:[#allocation5 + $0x28] sm:$0xff]  ;;  %v100_v35 = vld [vmem:[#allocation5 + $0xb0] sm:$0xff] }
  0x3e   :  { %v114_v32 = vld [vmem:[#allocation5 + $0x120] sm:$0xff]  ;;  %v115_v33 = vld [vmem:[#allocation5 + $0x128] sm:$0xff]  ;;  %v845_v34 = vpack.c.bf16 %v83_v31, %v82_v29  ;;  %v101_v36 = vld [vmem:[#allocation5 + $0xb8] sm:$0xff] }
  0x3f   :  { %842 = vmatpush3.bf16.msra.mxu0 %v841_v21  ;;  %v132_v37 = vld [vmem:[#allocation5 + $0x1b0] sm:$0xff]  ;;  %v877_v38 = vpack.c.bf16 %v115_v33, %v114_v32  ;;  %v847_v39 = vpack.c.bf16 %v101_v36, %v100_v35  ;;  %v133_v40 = vld [vmem:[#allocation5 + $0x1b8] sm:$0xff]  ;;  %v102_v46 = vld [vmem:[#allocation5 + $0xc0] sm:$0xff] }
  0x40   :  { %874 = vmatpush3.bf16.msra.mxu1 %v873_v25  ;;  %844 = vmatprep.subr.bf16.mxu0 %v843_v26  ;;  %v84_v41 = vld [vmem:[#allocation5 + $0x30] sm:$0xff]  ;;  %v85_v42 = vld [vmem:[#allocation5 + $0x38] sm:$0xff]  ;;  %v879_v43 = vpack.c.bf16 %v133_v40, %v132_v37  ;;  %v103_v47 = vld [vmem:[#allocation5 + $0xc8] sm:$0xff] }
  0x41   :  { %876 = vmatprep.subr.bf16.mxu1 %v875_v30  ;;  %v116_v44 = vld [vmem:[#allocation5 + $0x130] sm:$0xff]  ;;  %v117_v45 = vld [vmem:[#allocation5 + $0x138] sm:$0xff]  ;;  %v134_v48 = vld [vmem:[#allocation5 + $0x1c0] sm:$0xff]  ;;  %v849_v50 = vpack.c.bf16 %v85_v42, %v84_v41  ;;  %v851_v52 = vpack.c.bf16 %v103_v47, %v102_v46 }
  0x42   :  { %v135_v49 = vld [vmem:[#allocation5 + $0x1c8] sm:$0xff]  ;;  %v881_v51 = vpack.c.bf16 %v117_v45, %v116_v44  ;;  %v86_v53 = vld [vmem:[#allocation5 + $0x40] sm:$0xff]  ;;  %v104_v58 = vld [vmem:[#allocation5 + $0xd0] sm:$0xff] }
  0x43   :  { %846 = vmatpush3.bf16.msra.mxu0 %v845_v34  ;;  %v87_v54 = vld [vmem:[#allocation5 + $0x48] sm:$0xff]  ;;  %v118_v55 = vld [vmem:[#allocation5 + $0x140] sm:$0xff]  ;;  %v883_v56 = vpack.c.bf16 %v135_v49, %v134_v48  ;;  %v105_v59 = vld [vmem:[#allocation5 + $0xd8] sm:$0xff] }
  0x44   :  { %878 = vmatpush3.bf16.msra.mxu1 %v877_v38  ;;  %848 = vmatprep.subr.bf16.mxu0 %v847_v39  ;;  %v119_v57 = vld [vmem:[#allocation5 + $0x148] sm:$0xff]  ;;  %v136_v60 = vld [vmem:[#allocation5 + $0x1d0] sm:$0xff]  ;;  %v137_v61 = vld [vmem:[#allocation5 + $0x1d8] sm:$0xff]  ;;  %v853_v62 = vpack.c.bf16 %v87_v54, %v86_v53  ;;  %v855_v0 = vpack.c.bf16 %v105_v59, %v104_v58 }
  0x45   :  { %880 = vmatprep.subr.bf16.mxu1 %v879_v43  ;;  %v885_v63 = vpack.c.bf16 %v119_v57, %v118_v55  ;;  %v88_v1 = vld [vmem:[#allocation5 + $0x50] sm:$0xff]  ;;  %v89_v2 = vld [vmem:[#allocation5 + $0x58] sm:$0xff]  ;;  %v887_v4 = vpack.c.bf16 %v137_v61, %v136_v60  ;;  %v106_v6 = vld [vmem:[#allocation5 + $0xe0] sm:$0xff] }
  0x46   :  { %v120_v3 = vld [vmem:[#allocation5 + $0x150] sm:$0xff]  ;;  %v121_v5 = vld [vmem:[#allocation5 + $0x158] sm:$0xff]  ;;  %v107_v7 = vld [vmem:[#allocation5 + $0xe8] sm:$0xff]  ;;  %v857_v10 = vpack.c.bf16 %v89_v2, %v88_v1 }
  0x47   :  { %850 = vmatpush3.bf16.msra.mxu0 %v849_v50  ;;  %v138_v8 = vld [vmem:[#allocation5 + $0x1e0] sm:$0xff]  ;;  %v139_v9 = vld [vmem:[#allocation5 + $0x1e8] sm:$0xff]  ;;  %v889_v13 = vpack.c.bf16 %v121_v5, %v120_v3  ;;  %v859_v14 = vpack.c.bf16 %v107_v7, %v106_v6  ;;  %v73_v17 = vld [vmem:[#allocation2 + $0x18] sm:$0xff] }
  0x48   :  { %882 = vmatpush3.bf16.msra.mxu1 %v881_v51  ;;  %852 = vmatprep.subr.bf16.mxu0 %v851_v52  ;;  %v90_v11 = vld [vmem:[#allocation5 + $0x60] sm:$0xff]  ;;  %v91_v12 = vld [vmem:[#allocation5 + $0x68] sm:$0xff]  ;;  %v891_v18 = vpack.c.bf16 %v139_v9, %v138_v8  ;;  %v108_v20 = vld [vmem:[#allocation5 + $0xf0] sm:$0xff] }
  0x49   :  { %884 = vmatprep.subr.bf16.mxu1 %v883_v56  ;;  %v122_v15 = vld [vmem:[#allocation5 + $0x160] sm:$0xff]  ;;  %v71_v16 = vld [vmem:[#allocation2 + $0x8] sm:$0xff]  ;;  %v109_v21 = vld [vmem:[#allocation5 + $0xf8] sm:$0xff]  ;;  %340 = vmatprep.mubr.f32.mxu1 %v73_v17  ;;  %v861_v24 = vpack.c.bf16 %v91_v12, %v90_v11 }
  0x4a   :  { %v123_v19 = vld [vmem:[#allocation5 + $0x168] sm:$0xff]  ;;  %270 = vmatprep.mubr.f32.mxu0 %v71_v16  ;;  %v140_v22 = vld [vmem:[#allocation5 + $0x1f0] sm:$0xff]  ;;  %v141_v23 = vld [vmem:[#allocation5 + $0x1f8] sm:$0xff]  ;;  %v863_v26 = vpack.c.bf16 %v109_v21, %v108_v20 }
  0x4b   :  { %854 = vmatpush3.bf16.msra.mxu0 %v853_v62  ;;  %v893_v25 = vpack.c.bf16 %v123_v19, %v122_v15  ;;  %v92_v27 = vld [vmem:[#allocation5 + $0x70] sm:$0xff]  ;;  %v93_v28 = vld [vmem:[#allocation5 + $0x78] sm:$0xff]  ;;  %v895_v30 = vpack.c.bf16 %v141_v23, %v140_v22  ;;  %v158_v32 = vld [vmem:[#allocation5 + $0x280] sm:$0xff] }
  0x4c   :  { %886 = vmatpush3.bf16.msra.mxu1 %v885_v63  ;;  %856 = vmatprep.subr.bf16.mxu0 %v855_v0  ;;  %v124_v29 = vld [vmem:[#allocation5 + $0x170] sm:$0xff]  ;;  %v125_v31 = vld [vmem:[#allocation5 + $0x178] sm:$0xff]  ;;  %v159_v33 = vld [vmem:[#allocation5 + $0x288] sm:$0xff]  ;;  %v865_v36 = vpack.c.bf16 %v93_v28, %v92_v27 }
  0x4d   :  { %888 = vmatprep.subr.bf16.mxu1 %v887_v4  ;;  %v190_v34 = vld [vmem:[#allocation5 + $0x380] sm:$0xff]  ;;  %v191_v35 = vld [vmem:[#allocation5 + $0x388] sm:$0xff]  ;;  %v897_v37 = vpack.c.bf16 %v125_v31, %v124_v29  ;;  %v899_v38 = vpack.c.bf16 %v159_v33, %v158_v32  ;;  %v160_v44 = vld [vmem:[#allocation5 + $0x290] sm:$0xff] }
  0x4e   :  { %v142_v39 = vld [vmem:[#allocation5 + $0x200] sm:$0xff]  ;;  %v143_v40 = vld [vmem:[#allocation5 + $0x208] sm:$0xff]  ;;  %v931_v42 = vpack.c.bf16 %v191_v35, %v190_v34  ;;  %v161_v45 = vld [vmem:[#allocation5 + $0x298] sm:$0xff] }
  0x4f   :  { %858 = vmatpush3.bf16.msra.mxu0 %v857_v10  ;;  %v174_v41 = vld [vmem:[#allocation5 + $0x300] sm:$0xff]  ;;  %v175_v43 = vld [vmem:[#allocation5 + $0x308] sm:$0xff]  ;;  %v192_v46 = vld [vmem:[#allocation5 + $0x390] sm:$0xff]  ;;  %v901_v50 = vpack.c.bf16 %v143_v40, %v142_v39  ;;  %v903_v52 = vpack.c.bf16 %v161_v45, %v160_v44 }
  0x50   :  { %890 = vmatpush3.bf16.msra.mxu1 %v889_v13  ;;  %860 = vmatprep.subr.bf16.mxu0 %v859_v14  ;;  %v193_v47 = vld [vmem:[#allocation5 + $0x398] sm:$0xff]  ;;  %v70_v48 = vld [vmem:[#allocation2] sm:$0xff]  ;;  %v72_v49 = vld [vmem:[#allocation2 + $0x10] sm:$0xff]  ;;  %v933_v51 = vpack.c.bf16 %v175_v43, %v174_v41 }
  0x51   :  { %892 = vmatprep.subr.bf16.mxu1 %v891_v18  ;;  %v144_v53 = vld [vmem:[#allocation5 + $0x210] sm:$0xff]  ;;  %v145_v54 = vld [vmem:[#allocation5 + $0x218] sm:$0xff]  ;;  %v935_v56 = vpack.c.bf16 %v193_v47, %v192_v46  ;;  %v162_v58 = vld [vmem:[#allocation5 + $0x2a0] sm:$0xff] }
  0x52   :  { %v176_v55 = vld [vmem:[#allocation5 + $0x310] sm:$0xff]  ;;  %v177_v57 = vld [vmem:[#allocation5 + $0x318] sm:$0xff]  ;;  %v163_v59 = vld [vmem:[#allocation5 + $0x2a8] sm:$0xff]  ;;  %v905_v62 = vpack.c.bf16 %v145_v54, %v144_v53 }
  0x53   :  { %862 = vmatpush3.bf16.msra.mxu0 %v861_v24  ;;  %v194_v60 = vld [vmem:[#allocation5 + $0x3a0] sm:$0xff]  ;;  %v195_v61 = vld [vmem:[#allocation5 + $0x3a8] sm:$0xff]  ;;  %v937_v63 = vpack.c.bf16 %v177_v57, %v176_v55  ;;  %v907_v0 = vpack.c.bf16 %v163_v59, %v162_v58  ;;  %v164_v6 = vld [vmem:[#allocation5 + $0x2b0] sm:$0xff] }
  0x54   :  { %894 = vmatpush3.bf16.msra.mxu1 %v893_v25  ;;  %864 = vmatprep.subr.bf16.mxu0 %v863_v26  ;;  %v146_v1 = vld [vmem:[#allocation5 + $0x220] sm:$0xff]  ;;  %v147_v2 = vld [vmem:[#allocation5 + $0x228] sm:$0xff]  ;;  %v939_v4 = vpack.c.bf16 %v195_v61, %v194_v60  ;;  %v165_v7 = vld [vmem:[#allocation5 + $0x2b8] sm:$0xff] }
  0x55   :  { %896 = vmatprep.subr.bf16.mxu1 %v895_v30  ;;  %v178_v3 = vld [vmem:[#allocation5 + $0x320] sm:$0xff]  ;;  %v179_v5 = vld [vmem:[#allocation5 + $0x328] sm:$0xff]  ;;  %v196_v8 = vld [vmem:[#allocation5 + $0x3b0] sm:$0xff]  ;;  %v909_v10 = vpack.c.bf16 %v147_v2, %v146_v1  ;;  %v911_v12 = vpack.c.bf16 %v165_v7, %v164_v6 }
  0x56   :  { %v197_v9 = vld [vmem:[#allocation5 + $0x3b8] sm:$0xff]  ;;  %v941_v11 = vpack.c.bf16 %v179_v5, %v178_v3  ;;  %v148_v13 = vld [vmem:[#allocation5 + $0x230] sm:$0xff]  ;;  %v166_v18 = vld [vmem:[#allocation5 + $0x2c0] sm:$0xff] }
  0x57   :  { %866 = vmatpush3.bf16.msra.mxu0 %v865_v36  ;;  %v149_v14 = vld [vmem:[#allocation5 + $0x238] sm:$0xff]  ;;  %v180_v15 = vld [vmem:[#allocation5 + $0x330] sm:$0xff]  ;;  %v943_v16 = vpack.c.bf16 %v197_v9, %v196_v8  ;;  %v167_v19 = vld [vmem:[#allocation5 + $0x2c8] sm:$0xff] }
  0x58   :  { %898 = vmatpush3.bf16.msra.mxu1 %v897_v37  ;;  %900 = vmatprep.subr.bf16.mxu0 %v899_v38  ;;  %v181_v17 = vld [vmem:[#allocation5 + $0x338] sm:$0xff]  ;;  %v198_v20 = vld [vmem:[#allocation5 + $0x3c0] sm:$0xff]  ;;  %v199_v21 = vld [vmem:[#allocation5 + $0x3c8] sm:$0xff]  ;;  %v913_v22 = vpack.c.bf16 %v149_v14, %v148_v13  ;;  %v915_v26 = vpack.c.bf16 %v167_v19, %v166_v18 }
  0x59   :  { %932 = vmatprep.subr.bf16.mxu1 %v931_v42  ;;  %v75_v23 = vld [vmem:[#allocation2 + $0x28] sm:$0xff]  ;;  %v77_v24 = vld [vmem:[#allocation2 + $0x38] sm:$0xff]  ;;  %v945_v25 = vpack.c.bf16 %v181_v17, %v180_v15  ;;  %v150_v27 = vld [vmem:[#allocation5 + $0x240] sm:$0xff]  ;;  %v947_v30 = vpack.c.bf16 %v199_v21, %v198_v20 }
  0x5a   :  { %271 = vmatmul.mubr.f32.vlgmr.msra.gmra.mrb[0].mxu0 %v70_v48  ;;  %v151_v28 = vld [vmem:[#allocation5 + $0x248] sm:$0xff]  ;;  %v182_v29 = vld [vmem:[#allocation5 + $0x340] sm:$0xff]  ;;  %v168_v32 = vld [vmem:[#allocation5 + $0x2d0] sm:$0xff] }
  0x5b   :  { %341 = vmatmul.mubr.f32.vlgmr.msra.gmra.mrb[0].mxu1 %v72_v49  ;;  %902 = vmatpush3.bf16.msra.mxu0 %v901_v50  ;;  %v183_v31 = vld [vmem:[#allocation5 + $0x348] sm:$0xff]  ;;  %v169_v33 = vld [vmem:[#allocation5 + $0x2d8] sm:$0xff]  ;;  %v200_v34 = vld [vmem:[#allocation5 + $0x3d0] sm:$0xff]  ;;  %v917_v36 = vpack.c.bf16 %v151_v28, %v150_v27 }
  0x5c   :  { %934 = vmatpush3.bf16.msra.mxu1 %v933_v51  ;;  %904 = vmatprep.subr.bf16.mxu0 %v903_v52  ;;  %v201_v35 = vld [vmem:[#allocation5 + $0x3d8] sm:$0xff]  ;;  %v949_v37 = vpack.c.bf16 %v183_v31, %v182_v29  ;;  %v919_v38 = vpack.c.bf16 %v169_v33, %v168_v32  ;;  %v152_v39 = vld [vmem:[#allocation5 + $0x250] sm:$0xff]  ;;  %v170_v44 = vld [vmem:[#allocation5 + $0x2e0] sm:$0xff]  ;;  %v1099_v33 = vmov 0.0  }
  0x5d   :  { %936 = vmatprep.subr.bf16.mxu1 %v935_v56  ;;  %410 = vmatprep.mubr.f32.mxu0 %v75_v23  ;;  %v153_v40 = vld [vmem:[#allocation5 + $0x258] sm:$0xff]  ;;  %v184_v41 = vld [vmem:[#allocation5 + $0x350] sm:$0xff]  ;;  %v951_v42 = vpack.c.bf16 %v201_v35, %v200_v34  ;;  %v171_v45 = vld [vmem:[#allocation5 + $0x2e8] sm:$0xff] }
  0x5e   :  { %480 = vmatprep.mubr.f32.mxu1 %v77_v24  ;;  %v185_v43 = vld [vmem:[#allocation5 + $0x358] sm:$0xff]  ;;  %v202_v46 = vld [vmem:[#allocation5 + $0x3e0] sm:$0xff]  ;;  %v203_v47 = vld [vmem:[#allocation5 + $0x3e8] sm:$0xff]  ;;  %v921_v48 = vpack.c.bf16 %v153_v40, %v152_v39  ;;  %v923_v50 = vpack.c.bf16 %v171_v45, %v170_v44 }
  0x5f   :  { %906 = vmatpush3.bf16.msra.mxu0 %v905_v62  ;;  %v953_v49 = vpack.c.bf16 %v185_v43, %v184_v41  ;;  %v154_v51 = vld [vmem:[#allocation5 + $0x260] sm:$0xff]  ;;  %v155_v52 = vld [vmem:[#allocation5 + $0x268] sm:$0xff]  ;;  %v955_v54 = vpack.c.bf16 %v203_v47, %v202_v46  ;;  %v172_v56 = vld [vmem:[#allocation5 + $0x2f0] sm:$0xff]  ;;  %v486_v41 = vlaneseq }
  0x60   :  { %938 = vmatpush3.bf16.msra.mxu1 %v937_v63  ;;  %908 = vmatprep.subr.bf16.mxu0 %v907_v0  ;;  %v186_v53 = vld [vmem:[#allocation5 + $0x360] sm:$0xff]  ;;  %v187_v55 = vld [vmem:[#allocation5 + $0x368] sm:$0xff]  ;;  %v173_v57 = vld [vmem:[#allocation5 + $0x2f8] sm:$0xff]  ;;  %v925_v60 = vpack.c.bf16 %v155_v52, %v154_v51 }
  0x61   :  { %940 = vmatprep.subr.bf16.mxu1 %v939_v4  ;;  %v204_v58 = vld [vmem:[#allocation5 + $0x3f0] sm:$0xff]  ;;  %v205_v59 = vld [vmem:[#allocation5 + $0x3f8] sm:$0xff]  ;;  %v957_v61 = vpack.c.bf16 %v187_v55, %v186_v53  ;;  %v927_v62 = vpack.c.bf16 %v173_v57, %v172_v56  ;;  %v74_v6 = vld [vmem:[#allocation2 + $0x20] sm:$0xff] }
  0x62   :  { %v156_v63 = vld [vmem:[#allocation5 + $0x270] sm:$0xff]  ;;  %v157_v0 = vld [vmem:[#allocation5 + $0x278] sm:$0xff]  ;;  %v959_v1 = vpack.c.bf16 %v205_v59, %v204_v58  ;;  %v537_v8 = vld [vmem:[#allocation7] sm:$0xff] }
  0x63   :  { %910 = vmatpush3.bf16.msra.mxu0 %v909_v10  ;;  %v188_v2 = vld [vmem:[#allocation5 + $0x370] sm:$0xff]  ;;  %v189_v3 = vld [vmem:[#allocation5 + $0x378] sm:$0xff]  ;;  %v929_v4 = vpack.c.bf16 %v157_v0, %v156_v63  ;;  %v538_v9 = vld [vmem:[#allocation7 + $0x8] sm:$0xff] }
  0x64   :  { %942 = vmatpush3.bf16.msra.mxu1 %v941_v11  ;;  %912 = vmatprep.subr.bf16.mxu0 %v911_v12  ;;  %v961_v5 = vpack.c.bf16 %v189_v3, %v188_v2  ;;  %v76_v7 = vld [vmem:[#allocation2 + $0x30] sm:$0xff]  ;;  %v1097_v11 = vmov 0.0|0.0   ;;  %v964_v12 = vpack.c.bf16 %v538_v9, %v537_v8  ;;  %v540_v13 = vld [vmem:[#allocation7 + $0x18] sm:$0xff]  ;;  %v541_v15 = vld [vmem:[#allocation7 + $0x20] sm:$0xff] }
  0x65   :  { %944 = vmatprep.subr.bf16.mxu1 %v943_v16  ;;  %v539_v10 = vld [vmem:[#allocation7 + $0x10] sm:$0xff]  ;;  %v542_v16 = vld [vmem:[#allocation7 + $0x28] sm:$0xff]  ;;  %v544_v19 = vld [vmem:[#allocation7 + $0x38] sm:$0xff] }
  0x66   :  { %v967_v14 = vpack.c.bf16 %v540_v13, %v539_v10  ;;  %v970_v17 = vpack.c.bf16 %v542_v16, %v541_v15  ;;  %v543_v18 = vld [vmem:[#allocation7 + $0x30] sm:$0xff]  ;;  %v545_v21 = vld [vmem:[#allocation7 + $0x40] sm:$0xff]  ;;  %v550_v28 = vld [vmem:[#allocation7 + $0x68] sm:$0xff] }
  0x67   :  { %914 = vmatpush3.bf16.msra.mxu0 %v913_v22  ;;  %v973_v20 = vpack.c.bf16 %v544_v19, %v543_v18  ;;  %v546_v22 = vld [vmem:[#allocation7 + $0x48] sm:$0xff]  ;;  %v547_v24 = vld [vmem:[#allocation7 + $0x50] sm:$0xff]  ;;  %v549_v27 = vld [vmem:[#allocation7 + $0x60] sm:$0xff] }
  0x68   :  { %946 = vmatpush3.bf16.msra.mxu1 %v945_v25  ;;  %916 = vmatprep.subr.bf16.mxu0 %v915_v26  ;;  %v976_v23 = vpack.c.bf16 %v546_v22, %v545_v21  ;;  %v548_v25 = vld [vmem:[#allocation7 + $0x58] sm:$0xff]  ;;  %v982_v29 = vpack.c.bf16 %v550_v28, %v549_v27 }
  0x69   :  { %948 = vmatprep.subr.bf16.mxu1 %v947_v30  ;;  %v979_v26 = vpack.c.bf16 %v548_v25, %v547_v24  ;;  %v551_v30 = vld [vmem:[#allocation7 + $0x70] sm:$0xff]  ;;  %v552_v31 = vld [vmem:[#allocation7 + $0x78] sm:$0xff] }
  0x6a   :  { %v985_v32 = vpack.c.bf16 %v552_v31, %v551_v30 }
  0x6b   :  { %918 = vmatpush3.bf16.msra.mxu0 %v917_v36 }
  0x6c   :  { %950 = vmatpush3.bf16.msra.mxu1 %v949_v37  ;;  %920 = vmatprep.subr.bf16.mxu0 %v919_v38 }
  0x6d   :  { %952 = vmatprep.subr.bf16.mxu1 %v951_v42  ;;  %v487_v42 = vshrl.u32 %v486_v41, 7 }
  0x6f   :  { %922 = vmatpush3.bf16.msra.mxu0 %v921_v48  ;;  %vm488_vm1 = vcmp.lt.s32.totalorder %v487_v42, 2  ;;  %v525_v8 = vsub.s32 0, %v487_v42 }
  0x70   :  { %954 = vmatpush3.bf16.msra.mxu1 %v953_v49  ;;  %924 = vmatprep.subr.bf16.mxu0 %v923_v50  ;;  %v642_v50 = vsel %vm488_vm1, 1.0, %v1099_v33 }
  0x71   :  { %956 = vmatprep.subr.bf16.mxu1 %v955_v54 }
  0x73   :  { %926 = vmatpush3.bf16.msra.mxu0 %v925_v60 }
  0x74   :  { %958 = vmatpush3.bf16.msra.mxu1 %v957_v61  ;;  %928 = vmatprep.subr.bf16.mxu0 %v927_v62 }
  0x75   :  { %960 = vmatprep.subr.bf16.mxu1 %v959_v1 }
  0x77   :  { %930 = vmatpush3.bf16.msra.mxu0 %v929_v4 }
  0x78   :  { %962 = vmatpush3.bf16.msra.mxu1 %v961_v5  ;;  %963 = vmatprep.subr.bf16.mxu0 %v1097_v11 }
  0x7a   :  { %411 = vmatmul.mubr.f32.vlgmr.msra.gmra.mrb[2].mxu0 %v74_v6 }
  0x7b   :  { %481 = vmatmul.mubr.f32.vlgmr.msra.gmra.mrb[2].mxu1 %v76_v7  ;;  %965 = vmatpush3.bf16.msra.mxu0 %v964_v12  ;;  %v514_v7 = vld [vmem:[%s1193_s2] sm:$0x1]  ;;  %s1064_s2 = scalar_lea.vmem %s631_s8, 128 }
  0x7c   :  { %966 = vmatprep.subr.bf16.mxu0 %v1097_v11  ;;  %832 = vmatprep.mubr.msk.f32.mxu0 %vm1098_vm0, %v1099_v33  ;;  %p1065_p10 = scmp.ne.s32.totalorder %s631_s8, %s1064_s2  ;;  %p1070_p12 = scmp.lt.s32.totalorder %s1064_s2, %s1064_s2 }
  0x7e   :  { %p1071_p13 = por %p1070_p12, %p1069_p11 }
  0x7f   :  { %968 = vmatpush3.bf16.msra.mxu0 %v967_v14 }
  0x80   :  { %969 = vmatprep.subr.bf16.mxu0 %v1097_v11  ;;  %p1072_p0 = pnand %p1071_p13, %p1065_p10 }
  0x83   :  { %971 = vmatpush3.bf16.msra.mxu0 %v970_v17 }
  0x84   :  { %972 = vmatprep.subr.bf16.mxu0 %v1097_v11 }
  0x87   :  { %974 = vmatpush3.bf16.msra.mxu0 %v973_v20 }
  0x88   :  { %975 = vmatprep.subr.bf16.mxu0 %v1097_v11 }
  0x8b   :  { %977 = vmatpush3.bf16.msra.mxu0 %v976_v23 }
  0x8c   :  { %978 = vmatprep.subr.bf16.mxu0 %v1097_v11 }
  0x8f   :  { %980 = vmatpush3.bf16.msra.mxu0 %v979_v26 }
  0x90   :  { %981 = vmatprep.subr.bf16.mxu0 %v1097_v11 }
  0x93   :  { %983 = vmatpush3.bf16.msra.mxu0 %v982_v29 }
  0x94   :  { %984 = vmatprep.subr.bf16.mxu0 %v1097_v11  ;;  %v516_v11 = vld [vmem:[%s1194_s3] sm:$0x1] }
  0x97   :  { %986 = vmatpush3.bf16.msra.mxu0 %v985_v32 }
 0x12d   :  { %v675_v34 = vpop.f32.mrb[0].mxu0 }
 0x12e   :  { %v710_v35 = vpop.f32.mrb[0].mxu1  ;;  %v676_v36 = vpop.f32.mrb[1].mxu0 }
 0x12f   :  { %v677_v37 = vadd.f32 %v676_v36, %v675_v34  ;;  %v711_v38 = vpop.f32.mrb[1].mxu1 }
 0x130   :  { %v712_v39 = vadd.f32 %v711_v38, %v710_v35 }
 0x132   :  { %v343_v40 = vadd.f32 %v712_v39, %v677_v37 }
 0x14d   :  { %v745_v43 = vpop.f32.mrb[2].mxu0 }
 0x14e   :  { %v746_v44 = vpop.f32.mrb[3].mxu0  ;;  %v780_v45 = vpop.f32.mrb[2].mxu1 }
 0x14f   :  { %v747_v46 = vadd.f32 %v746_v44, %v745_v43  ;;  %v781_v47 = vpop.f32.mrb[3].mxu1 }
 0x150   :  { %v782_v48 = vadd.f32 %v781_v47, %v780_v45 }
 0x151   :  { %v413_v49 = vadd.f32 %v747_v46, %v343_v40 }
 0x153   :  { %v483_v51 = vadd.f32 %v782_v48, %v413_v49 }
 0x155   :  { %v491_v52 = vmul.f32 %v642_v50, %v483_v51 }
 0x157   :  { %v492_v53 = vrot.slane %v491_v52, 4 }
 0x159   :  { %v493_v54 = vadd.f32 %v492_v53, %v491_v52 }
 0x15b   :  { %v494_v55 = vrot.slane %v493_v54, 2 }
 0x15d   :  { %v495_v56 = vadd.f32 %v494_v55, %v493_v54 }
 0x15f   :  { %v496_v57 = vrot.slane %v495_v56, 1 }
 0x161   :  { %v497_v58 = vadd.f32 %v496_v57, %v495_v56 }
 0x163   :  { %v498_v59 = vmul.f32 0.5, %v497_v58 }
 0x165   :  { %v499_v60 = vsub.f32 %v483_v51, %v498_v59 }
 0x167   :  { %v500_v61 = vmul.f32 %v642_v50, %v499_v60 }
 0x169   :  { %v501_v62 = vmul.f32 %v500_v61, %v500_v61 }
 0x16b   :  { %v502_v63 = vrot.slane %v501_v62, 4 }
 0x16d   :  { %v503_v0 = vadd.f32 %v502_v63, %v501_v62 }
 0x16f   :  { %v504_v1 = vrot.slane %v503_v0, 2 }
 0x171   :  { %v505_v2 = vadd.f32 %v504_v1, %v503_v0 }
 0x173   :  { %v506_v3 = vrot.slane %v505_v2, 1 }
 0x175   :  { %v507_v4 = vadd.f32 %v506_v3, %v505_v2 }
 0x177   :  { %v508_v5 = vmul.f32 0.5, %v507_v4 }
 0x179   :  { %v517_v6 = vadd.f32 1e-05, %v508_v5 }
 0x17b   :  { %996 = vrsqrt.f32 %v517_v6 }
 0x185   :  { %v997_v9 = vpop.eup %996 }
 0x186   :  { %v519_v10 = vmul.f32 %v997_v9, %v514_v7 }
 0x188   :  { %v520_v12 = vmul.f32 %v519_v10, %v498_v59  ;;  %v526_v13 = vrot.slane %v519_v10, %v525_v8 }
 0x18a   :  { %v521_v14 = vsub.f32 %v516_v11, %v520_v12  ;;  %v528_v15 = vmul.f32 %v526_v13, %v483_v51 }
 0x18c   :  { %v533_v16 = vrot.slane %v521_v14, %v525_v8 }
 0x18e   :  { %v535_v17 = vadd.f32 %v533_v16, %v528_v15 }
 0x190   :  { %v536_v18 = vmax.f32 %v535_v17, 0.0 }
 0x192   :  { %833 = vmatmul.mubr.f32.vlgmr.msra.gmra.mrb[4].mxu0 %v536_v18 }
 0x265   :  { %v619_v19 = vpop.f32.mrb[4].mxu0 }
 0x266   :  { %623 = vst [vmem:[#allocation8] sm:$0xff] %v619_v19  ;;  %v834_v20 = vpop.f32.mrb[5].mxu0 }
 0x267   :  { %1075 = shalt.err (!%p1072_p0)
}
 0x268   :  { %s1076_s10 = scalar_lea.hbm %s1196_s5, 128 }
 0x269   :  { %p1077_p1 = scmp.ne.s32.totalorder %s1196_s5, %s1076_s10  ;;  %p1080_p2 = scmp.lt.u32.totalorder %s1076_s10, %s1196_s5 }
 0x26b   :  { %p1082_p3 = pnand %p1080_p2, %p1077_p1 }
 0x26d   :  { %1085 = shalt.err (!%p1082_p3)
}
 0x26e   :  { %633 = dma.vmem_to_hbm [thread:$0]  %s631_s8, 128, %s1196_s5, [#allocation4]  }
 0x26f   :  { %1090 = dma.done.wait [#allocation4], 128  }
 0x270   :  { %1091 = vsyncadd [#allocation4], 4294967168 }
 0x271   :  { %637 = vsyncpa [#allocation3], 1 }
 0x272   :  { %638 = vsyncpa [#allocation6], 1 }
 0x273   :  { %639 = vsyncpa [#allocation4], 1 }

</bundles_post_ra>
